<compile_context>
chip_gen: v7x
topology: tpu7x:2x2x1
jax: 0.10.0
libtpu: 0.0.40
codegen_flags: <defaults>
</compile_context>

<pallas_src>
import functools

import jax
import jax.numpy as jnp
from jax import lax
from jax.experimental import pallas as pl
from jax.experimental.pallas import tpu as pltpu

LAMBDA_COORD = 5.0
LAMBDA_NOOBJ = 0.5

_N_PARTIALS = 6  # n_obj, n_noobj, coord_sum_sq, bce_obj, bce_noobj, ce_obj


def _transpose_tile(tile):
    """(tn, D) -> (D, tn) f32 via an identity matmul on the (otherwise idle) MXU.

    Exact: multiplying by an exact 0/1 identity at HIGHEST precision reproduces the
    values (up to the f32 cast), and it avoids relying on XLU transpose lowering for
    odd (tn, small-D) shapes.  MXU cost is negligible and its slot is unused here.
    """
    _, d = tile.shape
    eye = (lax.broadcasted_iota(jnp.int32, (d, d), 0) ==
           lax.broadcasted_iota(jnp.int32, (d, d), 1)).astype(tile.dtype)
    return lax.dot_general(
        eye, tile, (((1,), (1,)), ((), ())),          # contract both minor dims: I @ X^T
        precision=lax.Precision.HIGHEST,
        preferred_element_type=jnp.float32)


def _yolo_partial_kernel(pred_ref, tgt_ref, out_ref, *, n_cells):
    """Accumulate masked per-lane partial sums for one (tn, D) block of grid cells.

    pred_ref / tgt_ref : (tn, D) blocks in the native (cells, fields) layout.
    out_ref            : (1, 6, tn) VMEM-resident per-core accumulator; reduced to
                         scalars in the wrapper.
    """
    c = pl.program_id(0)
    i = pl.program_id(1)
    bpc = pl.num_programs(1)

    tn, d = pred_ref.shape
    num_classes = d - 5

    @pl.when(i == 0)
    def _init():
        out_ref[...] = jnp.zeros_like(out_ref)

    # Lane-dense (D, tn) view built on-chip; f32 compute after the DMA.
    pred = _transpose_tile(pred_ref[...])            # (d, tn) f32
    tgt = _transpose_tile(tgt_ref[...])              # (d, tn) f32

    # Tail mask: this block logically covers cells [start, start + tn); lanes past
    # n_cells (partial last block or a clamped duplicate block) must not leak into
    # either the obj or the noobj statistics.  Use selects, not multiplies, so any
    # stale NaN/Inf garbage in the unread part of the buffer is neutralized.
    start = (c * bpc + i) * tn
    lane = lax.broadcasted_iota(jnp.int32, (1, tn), 1)
    valid = (start + lane) < n_cells                  # (1, tn) bool
    pred = jnp.where(valid, pred, 0.0)
    tgt = jnp.where(valid, tgt, -1.0)                 # conf = -1 -> neither obj nor noobj

    tconf = tgt[4:5, :]                               # (1, tn)
    obj = (tconf == 1.0).astype(jnp.float32)
    noobj = (tconf == 0.0).astype(jnp.float32)

    # --- coord term: per-cell sum over the 4 box fields of squared error ------------
    diff = pred[0:4, :] - tgt[0:4, :]
    ssq = jnp.sum(diff * diff, axis=0, keepdims=True)             # (1, tn)

    # --- objectness: BCE-with-logits, numerically stable form -----------------------
    # log(1 + exp(-|x|)): argument in [1, 2], well conditioned (~1 ulp vs log1p).
    x = pred[4:5, :]
    bce = jnp.maximum(x, 0.0) - x * tconf + jnp.log(1.0 + jnp.exp(-jnp.abs(x)))

    # --- class term: CE(pred_classes, argmax(target_classes)) over obj cells --------
    pcls = pred[5:, :]                                            # (C, tn)
    tcls = tgt[5:, :]
    tmax = jnp.max(tcls, axis=0, keepdims=True)                   # (1, tn)
    cls_col = lax.broadcasted_iota(jnp.int32, (num_classes, 1), 0).astype(jnp.float32)
    # first-occurrence argmax along the class (sublane) axis, matches torch.argmax
    idx = jnp.min(jnp.where(tcls == tmax, cls_col, float(num_classes)),
                  axis=0, keepdims=True)                          # (1, tn)
    onehot = (cls_col == idx).astype(jnp.float32)                 # (C, tn)
    m = jnp.max(pcls, axis=0, keepdims=True)
    lse = m + jnp.log(jnp.sum(jnp.exp(pcls - m), axis=0, keepdims=True))
    picked = jnp.sum(pcls * onehot, axis=0, keepdims=True)
    ce = lse - picked                                             # (1, tn)

    # --- per-lane accumulation: no cross-lane reductions in the steady state --------
    rows = (obj, noobj, ssq * obj, bce * obj, bce * noobj, ce * obj)
    row_id = lax.broadcasted_iota(jnp.int32, (_N_PARTIALS, 1), 0)
    upd = jnp.zeros((_N_PARTIALS, tn), jnp.float32)
    for k, r in enumerate(rows):
        upd = upd + jnp.where(row_id == k, r, 0.0)                # (6, tn)
    out_ref[...] += upd[None]


def _default_ncores():
    """2 TensorCores per chip on v7x; 1 on v5e / v6e."""
    try:
        kind = jax.devices()[0].device_kind.lower()
    except Exception:
        return 1
    return 2 if "v7" in kind else 1


@functools.partial(jax.jit, static_argnames=("tn", "ncores"))
def yolo_loss(predictions, targets, *, tn=None, ncores=None):
    """YOLO loss matching the PyTorch YOLOLoss module.

    predictions / targets: (..., 5 + num_classes) arrays of identical shape, any float
    dtype (kept native in HBM; cast to f32 inside the kernel after the DMA).
    Precondition (same as torch): at least one obj and one noobj cell, otherwise the
    corresponding mean is NaN.
    """
    D = predictions.shape[-1]
    p2 = predictions.reshape(-1, D)
    t2 = targets.reshape(-1, D)
    n = p2.shape[0]

    if ncores is None:
        ncores = _default_ncores()
    ncores = max(1, int(ncores))

    # Tile heuristic: aim for >= 4 inner blocks per core with 512-2048 cells per block
    # (keeps the input DMA double-buffered and comfortably under the scoped VMEM limit
    # even on v7x with C = 80); fall back to a single full-extent block for tiny N.
    if tn is None:
        if n <= 128:
            tn = n
        else:
            target = n // (ncores * 4)
            tn = max(512, min(2048, (target // 128) * 128))
            tn = max(128, min(tn, (n // 128) * 128))
    tn = int(tn)
    if tn >= n:
        tn = n                      # full-extent block is always a legal block shape
    else:
        tn = max(8, (tn // 8) * 8)  # sublane-aligned (heuristic already gives x128)

    nblocks = -(-n // tn)
    ncores = min(ncores, nblocks)
    bpc = -(-nblocks // ncores)
    last_block = nblocks - 1

    def in_map(c, i):
        # Clamp so the (rare) trailing duplicate block of the last core stays in
        # bounds; its lanes are fully masked in-kernel via the start >= n test.
        return (jnp.minimum(c * bpc + i, last_block), 0)

    itemsize = jnp.dtype(p2.dtype).itemsize
    cost = pl.CostEstimate(
        flops=int(n * D * (4 * D + 12)),                  # 2 identity transposes + elementwise
        transcendentals=int(n * (D - 5 + 3)),             # exp/log for CE + BCE
        bytes_accessed=int(2 * n * D * itemsize + 4 * ncores * _N_PARTIALS * tn),
    )

    kernel = functools.partial(_yolo_partial_kernel, n_cells=n)

    partials = pl.pallas_call(
        kernel,
        out_shape=jax.ShapeDtypeStruct((ncores, _N_PARTIALS, tn), jnp.float32),
        grid_spec=pltpu.PrefetchScalarGridSpec(
            num_scalar_prefetch=0,
            grid=(ncores, bpc),
            in_specs=[
                pl.BlockSpec((tn, D), in_map),
                pl.BlockSpec((tn, D), in_map),
            ],
            out_specs=pl.BlockSpec((1, _N_PARTIALS, tn), lambda c, i: (c, 0, 0)),
        ),
        compiler_params=pltpu.CompilerParams(
            dimension_semantics=("parallel", "arbitrary")),
        cost_estimate=cost,
    )(p2, t2)

    sums = jnp.sum(partials, axis=(0, 2))                 # (6,) lane-wise partials -> scalars
    n_obj, n_noobj = sums[0], sums[1]
    sum_sq, bce_obj, bce_noobj, ce_obj = sums[2], sums[3], sums[4], sums[5]

    inv_obj = 1.0 / n_obj        # NaN when no obj cells -- same as torch mean over empty
    coord_loss = LAMBDA_COORD * 0.25 * sum_sq * inv_obj
    obj_loss = bce_obj * inv_obj
    noobj_loss = LAMBDA_NOOBJ * bce_noobj / n_noobj
    class_loss = ce_obj * inv_obj
    return coord_loss + obj_loss + noobj_loss + class_loss


def yolo_loss_ref(predictions, targets):
    """Pure-JAX reference mirroring the PyTorch module semantics."""
    D = predictions.shape[-1]
    p = predictions.reshape(-1, D).astype(jnp.float32)
    t = targets.reshape(-1, D).astype(jnp.float32)
    objf = (t[:, 4] == 1.0).astype(jnp.float32)[:, None]
    noobjf = (t[:, 4] == 0.0).astype(jnp.float32)[:, None]
    n_obj = jnp.sum(objf)
    n_noobj = jnp.sum(noobjf)

    coord = LAMBDA_COORD * jnp.sum(((p[:, :4] - t[:, :4]) ** 2) * objf) / (4.0 * n_obj)
    x = p[:, 4:5]
    y = t[:, 4:5]
    bce = jnp.maximum(x, 0.0) - x * y + jnp.log1p(jnp.exp(-jnp.abs(x)))
    obj_l = jnp.sum(bce * objf) / n_obj
    noobj_l = LAMBDA_NOOBJ * jnp.sum(bce * noobjf) / n_noobj
    pcls = p[:, 5:]
    labels = jnp.argmax(t[:, 5:], axis=-1)
    logp = pcls - jax.scipy.special.logsumexp(pcls, axis=-1, keepdims=True)
    ce = -jnp.take_along_axis(logp, labels[:, None], axis=-1)
    cls_l = jnp.sum(ce * objf) / n_obj
    return coord + obj_l + noobj_l + cls_l


if __name__ == "__main__":
    key = jax.random.PRNGKey(0)
    k1, k2, k3, k4 = jax.random.split(key, 4)

    B, S, C = 2, 13, 3          # batch, YOLO grid size, num classes -> N = 338 cells
    D = 5 + C                   # box(4) + conf(1) + classes(C)

    predictions = jax.random.normal(k1, (B, S, S, D), dtype=jnp.float32)

    tgt_boxes = jax.random.uniform(k2, (B, S, S, 4), dtype=jnp.float32)
    tgt_conf = jax.random.bernoulli(k3, 0.3, (B, S, S, 1)).astype(jnp.float32)  # exact 0/1
    tgt_cls = jax.random.uniform(k4, (B, S, S, C), dtype=jnp.float32)
    targets = jnp.concatenate([tgt_boxes, tgt_conf, tgt_cls], axis=-1)

    ref = yolo_loss_ref(predictions, targets)

    # Explicit tiny tiles: grid (2 cores x 2 blocks) with a partial tail block and a
    # clamped duplicate block -> exercises the in-kernel tail masking + core split.
    loss = jax.block_until_ready(yolo_loss(predictions, targets, tn=128, ncores=2))
    assert jnp.allclose(loss, ref, rtol=1e-5, atol=1e-5), (loss, ref)

    # Default heuristic path (device-derived ncores, auto tile size).
    loss2 = jax.block_until_ready(yolo_loss(predictions, targets))
    assert jnp.allclose(loss2, ref, rtol=1e-5, atol=1e-5), (loss2, ref)

    print("KERNEL_OK")
</pallas_src>

<mosaic_0001>
module attributes {stable_mosaic.version = 11 : i64} {
  func.func @_yolo_partial_kernel(%arg0: i32, %arg1: i32, %arg2: memref<128x8xf32, #tpu.memory_space<vmem>>, %arg3: memref<128x8xf32, #tpu.memory_space<vmem>>, %arg4: memref<1x6x128xf32, #tpu.memory_space<vmem>>) attributes {dimension_semantics = [#tpu.dimension_semantics<parallel>, #tpu.dimension_semantics<arbitrary>], iteration_bounds = array<i64: 2, 2>, scalar_prefetch = 0 : i64, scratch_operands = 0 : i64, tpu.core_type = #tpu.core_type<tc>, window_params = [{transform_indices = @transform_0, window_bounds = array<i64: 128, 8>}, {transform_indices = @transform_1, window_bounds = array<i64: 128, 8>}, {transform_indices = @transform_2, window_bounds = array<i64: 1, 6, 128>}]} {
    %c0_i32 = arith.constant 0 : i32
    %0 = arith.cmpi eq, %arg1, %c0_i32 : i32
    %1 = arith.extui %0 : i1 to i32
    %c0_i32_0 = arith.constant 0 : i32
    %2 = arith.cmpi ne, %1, %c0_i32_0 : i32
    scf.if %2 {
      %cst_34 = arith.constant 0.000000e+00 : f32
      %157 = vector.broadcast %cst_34 : f32 to vector<1x6x128xf32>
      %c0_35 = arith.constant 0 : index
      %c0_36 = arith.constant 0 : index
      %c0_37 = arith.constant 0 : index
      %158 = vector.load %arg4[%c0_35, %c0_36, %c0_37] : memref<1x6x128xf32, #tpu.memory_space<vmem>>, vector<1x6x128xf32>
      tpu.vector_store %arg4[%c0_35, %c0_36, %c0_37], %157 {strides = array<i32>} : memref<1x6x128xf32, #tpu.memory_space<vmem>>, vector<1x6x128xf32>,
    } else {
    }
    %c0 = arith.constant 0 : index
    %c0_1 = arith.constant 0 : index
    %3 = vector.load %arg2[%c0, %c0_1] : memref<128x8xf32, #tpu.memory_space<vmem>>, vector<128x8xf32>
    %4 = tpu.iota {dimensions = array<i32: 0>} : vector<8x8xi32>
    %5 = tpu.iota {dimensions = array<i32: 1>} : vector<8x8xi32>
    %6 = arith.cmpi eq, %4, %5 : vector<8x8xi32>
    %7 = arith.extui %6 : vector<8x8xi1> to vector<8x8xi32>
    %8 = arith.sitofp %7 : vector<8x8xi32> to vector<8x8xf32>
    %cst = arith.constant dense<0.000000e+00> : vector<8x128xf32>
    %9 = tpu.matmul %8, %3, %cst {dimension_numbers = #tpu.dot_dimension_numbers<[1], [1], [0], [0], [0, 0, 1, 0], [], []>, precision = #tpu.contract_precision<fp32>} : vector<8x8xf32>, vector<128x8xf32>, vector<8x128xf32> -> vector<8x128xf32>
    %c0_2 = arith.constant 0 : index
    %c0_3 = arith.constant 0 : index
    %10 = vector.load %arg3[%c0_2, %c0_3] : memref<128x8xf32, #tpu.memory_space<vmem>>, vector<128x8xf32>
    %11 = tpu.iota {dimensions = array<i32: 0>} : vector<8x8xi32>
    %12 = tpu.iota {dimensions = array<i32: 1>} : vector<8x8xi32>
    %13 = arith.cmpi eq, %11, %12 : vector<8x8xi32>
    %14 = arith.extui %13 : vector<8x8xi1> to vector<8x8xi32>
    %15 = arith.sitofp %14 : vector<8x8xi32> to vector<8x8xf32>
    %cst_4 = arith.constant dense<0.000000e+00> : vector<8x128xf32>
    %16 = tpu.matmul %15, %10, %cst_4 {dimension_numbers = #tpu.dot_dimension_numbers<[1], [1], [0], [0], [0, 0, 1, 0], [], []>, precision = #tpu.contract_precision<fp32>} : vector<8x8xf32>, vector<128x8xf32>, vector<8x128xf32> -> vector<8x128xf32>
    %c2_i32 = arith.constant 2 : i32
    %17 = arith.muli %arg0, %c2_i32 : i32
    %18 = arith.addi %17, %arg1 : i32
    %c128_i32 = arith.constant 128 : i32
    %19 = arith.muli %18, %c128_i32 : i32
    %20 = tpu.iota {dimensions = array<i32: 1>} : vector<1x128xi32>
    %21 = vector.broadcast %19 : i32 to vector<1x128xi32>
    %22 = arith.addi %21, %20 : vector<1x128xi32>
    %c338_i32 = arith.constant 338 : i32
    %23 = vector.broadcast %c338_i32 : i32 to vector<1x128xi32>
    %24 = arith.cmpi slt, %22, %23 : vector<1x128xi32>
    %cst_5 = arith.constant 0.000000e+00 : f32
    %25 = vector.shape_cast %24 : vector<1x128xi1> to vector<1x128xi1>
    %26 = vector.broadcast %25 : vector<1x128xi1> to vector<8x128xi1>
    %27 = vector.broadcast %cst_5 : f32 to vector<8x128xf32>
    %28 = arith.select %26, %9, %27 : vector<8x128xi1>, vector<8x128xf32>
    %cst_6 = arith.constant -1.000000e+00 : f32
    %29 = vector.shape_cast %24 : vector<1x128xi1> to vector<1x128xi1>
    %30 = vector.broadcast %29 : vector<1x128xi1> to vector<8x128xi1>
    %31 = vector.broadcast %cst_6 : f32 to vector<8x128xf32>
    %32 = arith.select %30, %16, %31 : vector<8x128xi1>, vector<8x128xf32>
    %33 = vector.extract_strided_slice %32 {offsets = [4, 0], sizes = [1, 128], strides = [1, 1]} : vector<8x128xf32> to vector<1x128xf32>
    %cst_7 = arith.constant 1.000000e+00 : f32
    %34 = vector.broadcast %cst_7 : f32 to vector<1x128xf32>
    %35 = arith.cmpf oeq, %33, %34 : vector<1x128xf32>
    %36 = arith.extui %35 : vector<1x128xi1> to vector<1x128xi32>
    %37 = arith.sitofp %36 : vector<1x128xi32> to vector<1x128xf32>
    %cst_8 = arith.constant 0.000000e+00 : f32
    %38 = vector.broadcast %cst_8 : f32 to vector<1x128xf32>
    %39 = arith.cmpf oeq, %33, %38 : vector<1x128xf32>
    %40 = arith.extui %39 : vector<1x128xi1> to vector<1x128xi32>
    %41 = arith.sitofp %40 : vector<1x128xi32> to vector<1x128xf32>
    %42 = vector.extract_strided_slice %28 {offsets = [0, 0], sizes = [4, 128], strides = [1, 1]} : vector<8x128xf32> to vector<4x128xf32>
    %43 = vector.extract_strided_slice %32 {offsets = [0, 0], sizes = [4, 128], strides = [1, 1]} : vector<8x128xf32> to vector<4x128xf32>
    %44 = arith.subf %42, %43 : vector<4x128xf32>
    %45 = arith.mulf %44, %44 : vector<4x128xf32>
    %cst_9 = arith.constant dense<0.000000e+00> : vector<128xf32>
    %46 = vector.multi_reduction <add>, %45, %cst_9 [0] : vector<4x128xf32> to vector<128xf32>
    %47 = vector.shape_cast %46 : vector<128xf32> to vector<1x128xf32>
    %48 = vector.extract_strided_slice %28 {offsets = [4, 0], sizes = [1, 128], strides = [1, 1]} : vector<8x128xf32> to vector<1x128xf32>
    %cst_10 = arith.constant 0.000000e+00 : f32
    %49 = vector.broadcast %cst_10 : f32 to vector<1x128xf32>
    %50 = arith.maximumf %48, %49 : vector<1x128xf32>
    %51 = arith.mulf %48, %33 : vector<1x128xf32>
    %52 = arith.subf %50, %51 : vector<1x128xf32>
    %53 = math.absf %48 : vector<1x128xf32>
    %cst_11 = arith.constant 0.000000e+00 : f32
    %54 = vector.broadcast %cst_11 : f32 to vector<1x128xf32>
    %55 = arith.subf %54, %53 : vector<1x128xf32>
    %56 = math.exp %55 : vector<1x128xf32>
    %cst_12 = arith.constant 1.000000e+00 : f32
    %57 = vector.broadcast %cst_12 : f32 to vector<1x128xf32>
    %58 = arith.addf %57, %56 : vector<1x128xf32>
    %59 = math.log %58 : vector<1x128xf32>
    %60 = arith.addf %52, %59 : vector<1x128xf32>
    %61 = vector.extract_strided_slice %28 {offsets = [5, 0], sizes = [3, 128], strides = [1, 1]} : vector<8x128xf32> to vector<3x128xf32>
    %62 = vector.extract_strided_slice %32 {offsets = [5, 0], sizes = [3, 128], strides = [1, 1]} : vector<8x128xf32> to vector<3x128xf32>
    %cst_13 = arith.constant dense<0xFF800000> : vector<128xf32>
    %63 = vector.multi_reduction <maximumf>, %62, %cst_13 [0] : vector<3x128xf32> to vector<128xf32>
    %64 = vector.shape_cast %63 : vector<128xf32> to vector<1x128xf32>
    %65 = tpu.iota {dimensions = array<i32: 0>} : vector<3x1xi32>
    %66 = arith.sitofp %65 : vector<3x1xi32> to vector<3x1xf32>
    %67 = vector.broadcast %64 : vector<1x128xf32> to vector<3x128xf32>
    %68 = arith.cmpf oeq, %62, %67 : vector<3x128xf32>
    %cst_14 = arith.constant 3.000000e+00 : f32
    %69 = vector.shape_cast %66 : vector<3x1xf32> to vector<3x1xf32>
    %70 = vector.broadcast %69 : vector<3x1xf32> to vector<3x128xf32>
    %71 = vector.broadcast %cst_14 : f32 to vector<3x128xf32>
    %72 = arith.select %68, %70, %71 : vector<3x128xi1>, vector<3x128xf32>
    %cst_15 = arith.constant dense<0x7F800000> : vector<128xf32>
    %73 = vector.multi_reduction <minimumf>, %72, %cst_15 [0] : vector<3x128xf32> to vector<128xf32>
    %74 = vector.shape_cast %73 : vector<128xf32> to vector<1x128xf32>
    %75 = vector.broadcast %66 : vector<3x1xf32> to vector<3x128xf32>
    %76 = vector.broadcast %74 : vector<1x128xf32> to vector<3x128xf32>
    %77 = arith.cmpf oeq, %75, %76 : vector<3x128xf32>
    %78 = arith.extui %77 : vector<3x128xi1> to vector<3x128xi32>
    %79 = arith.sitofp %78 : vector<3x128xi32> to vector<3x128xf32>
    %cst_16 = arith.constant dense<0xFF800000> : vector<128xf32>
    %80 = vector.multi_reduction <maximumf>, %61, %cst_16 [0] : vector<3x128xf32> to vector<128xf32>
    %81 = vector.shape_cast %80 : vector<128xf32> to vector<1x128xf32>
    %82 = vector.broadcast %81 : vector<1x128xf32> to vector<3x128xf32>
    %83 = arith.subf %61, %82 : vector<3x128xf32>
    %84 = math.exp %83 : vector<3x128xf32>
    %cst_17 = arith.constant dense<0.000000e+00> : vector<128xf32>
    %85 = vector.multi_reduction <add>, %84, %cst_17 [0] : vector<3x128xf32> to vector<128xf32>
    %86 = vector.shape_cast %85 : vector<128xf32> to vector<1x128xf32>
    %87 = math.log %86 : vector<1x128xf32>
    %88 = arith.addf %81, %87 : vector<1x128xf32>
    %89 = arith.mulf %61, %79 : vector<3x128xf32>
    %cst_18 = arith.constant dense<0.000000e+00> : vector<128xf32>
    %90 = vector.multi_reduction <add>, %89, %cst_18 [0] : vector<3x128xf32> to vector<128xf32>
    %91 = vector.shape_cast %90 : vector<128xf32> to vector<1x128xf32>
    %92 = arith.subf %88, %91 : vector<1x128xf32>
    %93 = arith.mulf %47, %37 : vector<1x128xf32>
    %94 = arith.mulf %60, %37 : vector<1x128xf32>
    %95 = arith.mulf %60, %41 : vector<1x128xf32>
    %96 = arith.mulf %92, %37 : vector<1x128xf32>
    %97 = tpu.iota {dimensions = array<i32: 0>} : vector<6x1xi32>
    %cst_19 = arith.constant 0.000000e+00 : f32
    %98 = vector.broadcast %cst_19 : f32 to vector<6x128xf32>
    %c0_i32_20 = arith.constant 0 : i32
    %99 = vector.broadcast %c0_i32_20 : i32 to vector<6x1xi32>
    %100 = arith.cmpi eq, %97, %99 : vector<6x1xi32>
    %cst_21 = arith.constant 0.000000e+00 : f32
    %101 = vector.shape_cast %100 : vector<6x1xi1> to vector<6x1xi1>
    %102 = vector.broadcast %101 : vector<6x1xi1> to vector<6x128xi1>
    %103 = vector.shape_cast %37 : vector<1x128xf32> to vector<1x128xf32>
    %104 = vector.broadcast %103 : vector<1x128xf32> to vector<6x128xf32>
    %105 = vector.broadcast %cst_21 : f32 to vector<6x128xf32>
    %106 = arith.select %102, %104, %105 : vector<6x128xi1>, vector<6x128xf32>
    %107 = arith.addf %98, %106 : vector<6x128xf32>
    %c1_i32 = arith.constant 1 : i32
    %108 = vector.broadcast %c1_i32 : i32 to vector<6x1xi32>
    %109 = arith.cmpi eq, %97, %108 : vector<6x1xi32>
    %cst_22 = arith.constant 0.000000e+00 : f32
    %110 = vector.shape_cast %109 : vector<6x1xi1> to vector<6x1xi1>
    %111 = vector.broadcast %110 : vector<6x1xi1> to vector<6x128xi1>
    %112 = vector.shape_cast %41 : vector<1x128xf32> to vector<1x128xf32>
    %113 = vector.broadcast %112 : vector<1x128xf32> to vector<6x128xf32>
    %114 = vector.broadcast %cst_22 : f32 to vector<6x128xf32>
    %115 = arith.select %111, %113, %114 : vector<6x128xi1>, vector<6x128xf32>
    %116 = arith.addf %107, %115 : vector<6x128xf32>
    %c2_i32_23 = arith.constant 2 : i32
    %117 = vector.broadcast %c2_i32_23 : i32 to vector<6x1xi32>
    %118 = arith.cmpi eq, %97, %117 : vector<6x1xi32>
    %cst_24 = arith.constant 0.000000e+00 : f32
    %119 = vector.shape_cast %118 : vector<6x1xi1> to vector<6x1xi1>
    %120 = vector.broadcast %119 : vector<6x1xi1> to vector<6x128xi1>
    %121 = vector.shape_cast %93 : vector<1x128xf32> to vector<1x128xf32>
    %122 = vector.broadcast %121 : vector<1x128xf32> to vector<6x128xf32>
    %123 = vector.broadcast %cst_24 : f32 to vector<6x128xf32>
    %124 = arith.select %120, %122, %123 : vector<6x128xi1>, vector<6x128xf32>
    %125 = arith.addf %116, %124 : vector<6x128xf32>
    %c3_i32 = arith.constant 3 : i32
    %126 = vector.broadcast %c3_i32 : i32 to vector<6x1xi32>
    %127 = arith.cmpi eq, %97, %126 : vector<6x1xi32>
    %cst_25 = arith.constant 0.000000e+00 : f32
    %128 = vector.shape_cast %127 : vector<6x1xi1> to vector<6x1xi1>
    %129 = vector.broadcast %128 : vector<6x1xi1> to vector<6x128xi1>
    %130 = vector.shape_cast %94 : vector<1x128xf32> to vector<1x128xf32>
    %131 = vector.broadcast %130 : vector<1x128xf32> to vector<6x128xf32>
    %132 = vector.broadcast %cst_25 : f32 to vector<6x128xf32>
    %133 = arith.select %129, %131, %132 : vector<6x128xi1>, vector<6x128xf32>
    %134 = arith.addf %125, %133 : vector<6x128xf32>
    %c4_i32 = arith.constant 4 : i32
    %135 = vector.broadcast %c4_i32 : i32 to vector<6x1xi32>
    %136 = arith.cmpi eq, %97, %135 : vector<6x1xi32>
    %cst_26 = arith.constant 0.000000e+00 : f32
    %137 = vector.shape_cast %136 : vector<6x1xi1> to vector<6x1xi1>
    %138 = vector.broadcast %137 : vector<6x1xi1> to vector<6x128xi1>
    %139 = vector.shape_cast %95 : vector<1x128xf32> to vector<1x128xf32>
    %140 = vector.broadcast %139 : vector<1x128xf32> to vector<6x128xf32>
    %141 = vector.broadcast %cst_26 : f32 to vector<6x128xf32>
    %142 = arith.select %138, %140, %141 : vector<6x128xi1>, vector<6x128xf32>
    %143 = arith.addf %134, %142 : vector<6x128xf32>
    %c5_i32 = arith.constant 5 : i32
    %144 = vector.broadcast %c5_i32 : i32 to vector<6x1xi32>
    %145 = arith.cmpi eq, %97, %144 : vector<6x1xi32>
    %cst_27 = arith.constant 0.000000e+00 : f32
    %146 = vector.shape_cast %145 : vector<6x1xi1> to vector<6x1xi1>
    %147 = vector.broadcast %146 : vector<6x1xi1> to vector<6x128xi1>
    %148 = vector.shape_cast %96 : vector<1x128xf32> to vector<1x128xf32>
    %149 = vector.broadcast %148 : vector<1x128xf32> to vector<6x128xf32>
    %150 = vector.broadcast %cst_27 : f32 to vector<6x128xf32>
    %151 = arith.select %147, %149, %150 : vector<6x128xi1>, vector<6x128xf32>
    %152 = arith.addf %143, %151 : vector<6x128xf32>
    %c0_28 = arith.constant 0 : index
    %c0_29 = arith.constant 0 : index
    %c0_30 = arith.constant 0 : index
    %153 = vector.load %arg4[%c0_28, %c0_29, %c0_30] : memref<1x6x128xf32, #tpu.memory_space<vmem>>, vector<1x6x128xf32>
    %154 = vector.shape_cast %152 : vector<6x128xf32> to vector<1x6x128xf32>
    %155 = arith.addf %153, %154 : vector<1x6x128xf32>
    %c0_31 = arith.constant 0 : index
    %c0_32 = arith.constant 0 : index
    %c0_33 = arith.constant 0 : index
    %156 = vector.load %arg4[%c0_31, %c0_32, %c0_33] : memref<1x6x128xf32, #tpu.memory_space<vmem>>, vector<1x6x128xf32>
    tpu.vector_store %arg4[%c0_31, %c0_32, %c0_33], %155 {strides = array<i32>} : memref<1x6x128xf32, #tpu.memory_space<vmem>>, vector<1x6x128xf32>,
    return
  }
  func.func @transform_0(%arg0: i32, %arg1: i32) -> (i32, i32) {
    %c2_i32 = arith.constant 2 : i32
    %0 = arith.muli %arg0, %c2_i32 : i32
    %1 = arith.addi %0, %arg1 : i32
    %c2_i32_0 = arith.constant 2 : i32
    %2 = arith.minsi %1, %c2_i32_0 : i32
    %c0_i32 = arith.constant 0 : i32
    %c0_i32_1 = arith.constant 0 : i32
    return %2, %c0_i32 : i32, i32
  }
  func.func @transform_1(%arg0: i32, %arg1: i32) -> (i32, i32) {
    %c2_i32 = arith.constant 2 : i32
    %0 = arith.muli %arg0, %c2_i32 : i32
    %1 = arith.addi %0, %arg1 : i32
    %c2_i32_0 = arith.constant 2 : i32
    %2 = arith.minsi %1, %c2_i32_0 : i32
    %c0_i32 = arith.constant 0 : i32
    %c0_i32_1 = arith.constant 0 : i32
    return %2, %c0_i32 : i32, i32
  }
  func.func @transform_2(%arg0: i32, %arg1: i32) -> (i32, i32, i32) {
    %c0_i32 = arith.constant 0 : i32
    %c0_i32_0 = arith.constant 0 : i32
    %c0_i32_1 = arith.constant 0 : i32
    return %arg0, %c0_i32, %c0_i32_0 : i32, i32, i32
  }
}

</mosaic_0001>

<bundles_post_ra>
// kernel: yolo_loss.1
= control target key start
LH: loop header
LB: loop body
LE: loop exit
PB: predicated region body
PF: predicated region fallthrough
CT: control target
= control target key end

     0   :  { %s3011_s9 = smov 0   ;;  %s3013_s10 = smov 0   ;;  %s3931_s0 = inlined_call_operand.vmem [shape: f32[338,8], index: 0, kind: input, shape index: {}]   ;;  %s3932_s1 = inlined_call_operand.vmem [shape: f32[338,8], index: 1, kind: input, shape index: {}]   ;;  %s3933_s2 = inlined_call_operand.vmem [shape: f32[2,6,128], index: 2, kind: output, shape index: {}]  }
   0x1   :  { %s3015_s11 = smov 0   ;;  %s3017_s12 = smov 0  }
   0x2   :  { %s3019_s13 = smov 0  }
   0x3 LB: > { %s21_s14 = sadd.s32 1, %s2982_s11  ;;  %s24_s15 = sadd.s32 1, %s2986_s12  ;;  %s2990_s13 = sphi %s3019_s13, %s12_s13   ;;  %s2986_s12 = sphi %s3017_s12, %s4050_s12   ;;  %s2982_s11 = sphi %s3015_s11, %s4049_s11   ;;  %s2978_s10 = sphi %s3013_s10, %s4048_s10   ;;  %s2974_s9 = sphi %s3011_s9, %s4047_s9  }
   0x4   : > { %p22_p0 = scmp.ge.s32.totalorder %s21_s14, 2  ;;  %p1945_p1 = scmp.ge.s32.totalorder %s2990_s13, 1 }
   0x5   : > { %p184_p2 = scmp.lt.s32.totalorder %s2990_s13, 5 }
   0x6   : > { %s4052_s14 = smov (%p22_p0, %s21_s14), 0  ;;  %s4054_s15 = smov (!%p22_p0, %s24_s15), %s2986_s12 }
   0x7   : > { %p185_p3 = pnand %p1945_p1, %p184_p2  ;;  %p26_p4 = scmp.ge.s32.totalorder %s4054_s15, 2 }
   0x9   : > { %s4056_s15 = smov (%p26_p4, %s4054_s15), 0  ;;  %188 = sbr.rel (%p185_p3) target bundleno = 703 (0x2bf), region = 28 }
  0x10   : > { %s1946_s16 = sshll.u32 %s2978_s10, 1  ;;  %p270_p5 = scmp.lt.s32.totalorder %s2978_s10, 1 }
  0x11   : > { %s3044_s17 = sadd.s32 %s2974_s9, %s1946_s16  ;;  %p1953_p8 = scmp.ne.s32.totalorder %s2974_s9, 0 }
  0x12   : > { %p228_p6 = scmp.lt.s32.totalorder %s3044_s17, 2  ;;  %s4058_s10 = smov (!%p270_p5, %s2978_s10), 1  ;;  %v2992_v0 = vmov (!%p1953_p8), 0.0  }
  0x13   : > { %s1952_s19 = sshll.u32 %s4058_s10, 3 }
  0x14   : > { %s229_s18 = scalar_select %p228_p6, %s3044_s17, 2 }
  0x15   : > { %s3051_s23 = scalar_lea.vmem %s3933_s2, %s1952_s19  ;;  %277 = sbr.rel (%p1953_p8) target bundleno = 28 (0x1c), region = 32 }
  0x16   : > { %s1947_s20 = sshll.u32 %s229_s18, 4  ;;  %278 = vst [vmem:[%s3051_s23] sm:$0x3f] (!%p1953_p8), %v2992_v0 }
  0x17   : > { %p235_p7 = scmp.lt.s32.totalorder %s1947_s20, 42 }
  0x19   : > { %s4060_s20 = smov (!%p235_p7, %s1947_s20), 42 }
  0x1a   : > { %s1948_s24 = sshll.u32 %s4060_s20, 3 }
  0x1b   : > { %s3056_s27 = scalar_lea.vmem %s3931_s0, %s1948_s24  ;;  %s3061_s30 = scalar_lea.vmem %s3932_s1, %s1948_s24 }
  0x1c PF: > { %v279_v1 = vld [vmem:[%s3056_s27] sm:$0xff]  ;;  %v280_v2 = vld [vmem:[%s3056_s27 + $0x8] sm:$0xff]  ;;  %vm302_vm0 = vcmask 64512   ;;  %v3939_v4 = vmov 0.0|0.0   ;;  %v281_v9 = vld [vmem:[%s3056_s27 + $0x10] sm:$0xff]  ;;  %vm2994_vm1 = vmmov 0  }
  0x1d   : > { %v995_v3 = vld [vmem:[%s3061_s30] sm:$0xff]  ;;  %2592 = vmatprep.subr.bf16.mxu0 %v3939_v4  ;;  %2736 = vmatprep.subr.bf16.mxu1 %v3939_v4  ;;  %v3071_v5 = vsel %vm302_vm0, %v279_v1, 0  ;;  %v3074_v6 = vsel %vm302_vm0, %v280_v2, 0  ;;  %v996_v7 = vld [vmem:[%s3061_s30 + $0x8] sm:$0xff]  ;;  %v282_v10 = vld [vmem:[%s3056_s27 + $0x18] sm:$0xff]  ;;  %v3091_v17 = vsel %vm302_vm0, %v281_v9, 0 }
  0x1e   : > { %v3078_v8 = vsel %vm302_vm0, %v995_v3, 0  ;;  %v355_v11 = vand.u32 4294901760, %v3071_v5  ;;  %v358_v12 = vand.u32 4294901760, %v3074_v6  ;;  %v3085_v13 = vsel %vm302_vm0, %v996_v7, 0  ;;  %v997_v15 = vld [vmem:[%s3061_s30 + $0x10] sm:$0xff]  ;;  %v998_v19 = vld [vmem:[%s3061_s30 + $0x18] sm:$0xff] }
  0x1f   : > { %v1060_v14 = vand.u32 4294901760, %v3078_v8  ;;  %v1063_v16 = vand.u32 4294901760, %v3085_v13  ;;  %v3094_v18 = vsel %vm302_vm0, %v282_v10, 0  ;;  %v3104_v21 = vsel %vm302_vm0, %v997_v15, 0  ;;  %v283_v28 = vld [vmem:[%s3056_s27 + $0x20] sm:$0xff]  ;;  %v284_v29 = vld [vmem:[%s3056_s27 + $0x28] sm:$0xff] }
  0x20   : > { %v3101_v20 = vpack.c.bf16 %v358_v12, %v355_v11  ;;  %v361_v23 = vand.u32 4294901760, %v3091_v17  ;;  %v364_v24 = vand.u32 4294901760, %v3094_v18  ;;  %v3116_v25 = vsel %vm302_vm0, %v998_v19, 0  ;;  %v999_v30 = vld [vmem:[%s3061_s30 + $0x20] sm:$0xff]  ;;  %v1000_v31 = vld [vmem:[%s3061_s30 + $0x28] sm:$0xff]  ;;  %v285_v42 = vld [vmem:[%s3056_s27 + $0x30] sm:$0xff] }
  0x21   : > { %v3110_v22 = vpack.c.bf16 %v1063_v16, %v1060_v14  ;;  %v1066_v26 = vand.u32 4294901760, %v3104_v21  ;;  %v1069_v27 = vand.u32 4294901760, %v3116_v25  ;;  %v3140_v34 = vsel %vm302_vm0, %v283_v28, 0  ;;  %v286_v43 = vld [vmem:[%s3056_s27 + $0x38] sm:$0xff]  ;;  %v1001_v44 = vld [vmem:[%s3061_s30 + $0x30] sm:$0xff]  ;;  %v287_v56 = vld [vmem:[%s3056_s27 + $0x40] sm:$0xff] }
  0x22   : > { %2594 = vmatpush3.bf16.xpose.msra.mxu0 %v3101_v20  ;;  %v3131_v32 = vpack.c.bf16 %v364_v24, %v361_v23  ;;  %v3143_v35 = vsel %vm302_vm0, %v284_v29, 0  ;;  %v3146_v36 = vsel %vm302_vm0, %v999_v30, 0  ;;  %v3149_v37 = vsel %vm302_vm0, %v1000_v31, 0  ;;  %v1002_v45 = vld [vmem:[%s3061_s30 + $0x38] sm:$0xff]  ;;  %v288_v57 = vld [vmem:[%s3056_s27 + $0x48] sm:$0xff]  ;;  %v1003_v58 = vld [vmem:[%s3061_s30 + $0x40] sm:$0xff] }
  0x23   : > { %2738 = vmatpush3.bf16.xpose.msra.mxu1 %v3110_v22  ;;  %2595 = vmatprep.subr.bf16.mxu0 %v3939_v4  ;;  %v3137_v33 = vpack.c.bf16 %v1069_v27, %v1066_v26  ;;  %v367_v38 = vand.u32 4294901760, %v3140_v34  ;;  %v370_v39 = vand.u32 4294901760, %v3143_v35  ;;  %v1072_v40 = vand.u32 4294901760, %v3146_v36  ;;  %v1004_v59 = vld [vmem:[%s3061_s30 + $0x48] sm:$0xff]  ;;  %v289_v15 = vld [vmem:[%s3056_s27 + $0x50] sm:$0xff]  ;;  %v290_v19 = vld [vmem:[%s3056_s27 + $0x58] sm:$0xff] }
  0x24   : > { %2739 = vmatprep.subr.bf16.mxu1 %v3939_v4  ;;  %v1075_v41 = vand.u32 4294901760, %v3149_v37  ;;  %v3176_v48 = vsel %vm302_vm0, %v285_v42, 0  ;;  %v3179_v49 = vsel %vm302_vm0, %v286_v43, 0  ;;  %v3182_v50 = vsel %vm302_vm0, %v1001_v44, 0  ;;  %v1005_v28 = vld [vmem:[%s3061_s30 + $0x50] sm:$0xff]  ;;  %v1006_v29 = vld [vmem:[%s3061_s30 + $0x58] sm:$0xff] }
  0x25   : > { %v3167_v46 = vpack.c.bf16 %v370_v39, %v367_v38  ;;  %v3185_v51 = vsel %vm302_vm0, %v1002_v45, 0  ;;  %v373_v52 = vand.u32 4294901760, %v3176_v48  ;;  %v376_v53 = vand.u32 4294901760, %v3179_v49  ;;  %s1962_s3 = sshll.u32 %s3044_s17, 7 }
  0x26   : > { %v3173_v47 = vpack.c.bf16 %v1075_v41, %v1072_v40  ;;  %v1078_v54 = vand.u32 4294901760, %v3182_v50  ;;  %v1081_v55 = vand.u32 4294901760, %v3185_v51  ;;  %v3212_v62 = vsel %vm302_vm0, %v287_v56, 0 }
  0x27   : > { %v3203_v60 = vpack.c.bf16 %v376_v53, %v373_v52  ;;  %v3215_v63 = vsel %vm302_vm0, %v288_v57, 0  ;;  %v3218_v0 = vsel %vm302_vm0, %v1003_v58, 0  ;;  %v3221_v1 = vsel %vm302_vm0, %v1004_v59, 0 }
  0x28   : > { %v3209_v61 = vpack.c.bf16 %v1081_v55, %v1078_v54  ;;  %v3937_v2 = vmov 0.0   ;;  %v379_v3 = vand.u32 4294901760, %v3212_v62  ;;  %v3936_v7 = vand.u32 4294901760, %v3215_v63 }
  0x29   : > { %2204 = vmatprep.mubr.msk.f32.mxu0 %vm2994_vm1, %v3937_v2  ;;  %2414 = vmatprep.mubr.msk.f32.mxu1 %vm2994_vm1, %v3937_v2  ;;  %v3935_v9 = vand.u32 4294901760, %v3218_v0  ;;  %v3934_v10 = vand.u32 4294901760, %v3221_v1  ;;  %v337_v42 = vsel %vm302_vm0, %v289_v15, 0  ;;  %v340_v43 = vsel %vm302_vm0, %v290_v19, 0  ;;  %v291_v19 = vld [vmem:[%s3056_s27 + $0x60] sm:$0xff] }
  0x2a   : > { %2597 = vmatpush3.bf16.xpose.msra.mxu0 %v3131_v32  ;;  %v3241_v30 = vpack.c.bf16 %v3936_v7, %v379_v3  ;;  %v3252_v44 = vsel %vm302_vm0, %v1005_v28, 0  ;;  %v3255_v45 = vsel %vm302_vm0, %v1006_v29, 0  ;;  %v295_v56 = vlaneseq  ;;  %v292_v28 = vld [vmem:[%s3056_s27 + $0x68] sm:$0xff] }
  0x2b   : > { %2741 = vmatpush3.bf16.xpose.msra.mxu1 %v3137_v33  ;;  %2598 = vmatprep.subr.bf16.mxu0 %v3939_v4  ;;  %v3247_v31 = vpack.c.bf16 %v3934_v10, %v3935_v9  ;;  %v385_v57 = vand.u32 4294901760, %v337_v42  ;;  %v388_v58 = vand.u32 4294901760, %v340_v43  ;;  %v1090_v59 = vand.u32 4294901760, %v3252_v44 }
  0x2c   : > { %2742 = vmatprep.subr.bf16.mxu1 %v3939_v4  ;;  %3980 = vst [vmem:[#allocation2_spill] sm:$0xff] %v3241_v30  ;;  %v1093_v15 = vand.u32 4294901760, %v3255_v45  ;;  %v3267_v29 = vsub.f32 %v3071_v5, %v355_v11  ;;  %v3270_v10 = vshrl.u32 %v295_v56, 7  ;;  %v3272_v9 = vand.u32 127, %v295_v56  ;;  %v1007_v56 = vld [vmem:[%s3061_s30 + $0x60] sm:$0xff] }
  0x2d   : > { %3981 = vst [vmem:[#allocation3_spill] sm:$0xff] %v3247_v31  ;;  %v3277_v7 = vsub.f32 %v3074_v6, %v358_v12  ;;  %v3282_v2 = vsub.f32 %v3078_v8, %v1060_v14  ;;  %v3287_v5 = vsub.f32 %v3085_v13, %v1063_v16  ;;  %v3292_v11 = vsub.f32 %v3091_v17, %v361_v23 }
  0x2e   : > { %3982 = vst [vmem:[#allocation4_spill] sm:$0xff] %v3270_v10  ;;  %3983 = vst [vmem:[#allocation5_spill] sm:$0xff] %v3272_v9  ;;  %v3299_v6 = vsub.f32 %v3094_v18, %v364_v24  ;;  %v3301_v8 = vpack.c.bf16 %v388_v58, %v385_v57  ;;  %v343_v12 = vsel %vm302_vm0, %v291_v19, 0  ;;  %v346_v13 = vsel %vm302_vm0, %v292_v28, 0 }
  0x2f   : > { %v3308_v14 = vsub.f32 %v3104_v21, %v1066_v26  ;;  %v3313_v16 = vsub.f32 %v3116_v25, %v1069_v27  ;;  %v3318_v17 = vsub.f32 %v3140_v34, %v367_v38  ;;  %v3320_v18 = vpack.c.bf16 %v1093_v15, %v1090_v59  ;;  %v294_v38 = vld [vmem:[%s3056_s27 + $0x78] sm:$0xff] }
  0x30   : > { %3984 = vst [vmem:[#allocation6_spill] sm:$0xff] %v3301_v8  ;;  %v3325_v23 = vsub.f32 %v3143_v35, %v370_v39  ;;  %v1048_v21 = vsel %vm302_vm0, %v1007_v56, 0  ;;  %vm299_vm2 = vcmp.eq.s32.totalorder %v3270_v10, %v3272_v9  ;;  %v3334_v25 = vsub.f32 %v3146_v36, %v1072_v40  ;;  %v293_v35 = vld [vmem:[%s3056_s27 + $0x70] sm:$0xff] }
  0x31   : > { %3985 = vst [vmem:[#allocation7_spill] sm:$0xff] %v3320_v18  ;;  %v3339_v26 = vsub.f32 %v3149_v37, %v1075_v41  ;;  %v391_v27 = vand.u32 4294901760, %v343_v12  ;;  %v394_v34 = vand.u32 4294901760, %v346_v13  ;;  %v3351_v36 = vsub.f32 %v3179_v49, %v376_v53  ;;  %v1010_v53 = vld [vmem:[%s3061_s30 + $0x78] sm:$0xff] }
  0x32   : > { %2600 = vmatpush3.bf16.xpose.msra.mxu0 %v3167_v46  ;;  %v3356_v37 = vsub.f32 %v3182_v50, %v1078_v54  ;;  %v3361_v39 = vsub.f32 %v3185_v51, %v1081_v55  ;;  %v3365_v40 = vsub.f32 %v3212_v62, %v379_v3  ;;  %v3986_v41 = vmov 0.0|0.0  }
  0x33   : > { %2744 = vmatpush3.bf16.xpose.msra.mxu1 %v3173_v47  ;;  %2601 = vmatprep.subr.bf16.mxu0 %v3939_v4  ;;  %v3987_v50 = vmov 0.0   ;;  %v3988_v51 = vand.u32 4294901760, %v3215_v63  ;;  %v3989_v62 = vand.u32 4294901760, %v3218_v0  ;;  %v349_v19 = vsel %vm302_vm0, %v293_v35, 0 }
  0x34   : > { %2745 = vmatprep.subr.bf16.mxu1 %v3939_v4  ;;  %v3375_v54 = vsel %vm299_vm2, 1.0, %v3987_v50  ;;  %v352_v28 = vsel %vm302_vm0, %v294_v38, 0  ;;  %v3990_v56 = vand.u32 4294901760, %v3221_v1  ;;  %v3395_v9 = vsub.f32 %v337_v42, %v385_v57 }
  0x35   : > { %v3380_v55 = vsub.f32 %v3215_v63, %v3988_v51  ;;  %v3385_v3 = vsub.f32 %v3218_v0, %v3989_v62  ;;  %v3397_v63 = vsub.f32 %v340_v43, %v388_v58  ;;  %v3399_v51 = vpack.c.bf16 %v394_v34, %v391_v27 }
  0x36   : > { %v3393_v10 = vsub.f32 %v3221_v1, %v3990_v56  ;;  %v1057_v62 = vsel %vm302_vm0, %v1010_v53, 0  ;;  %v304_v35 = vsel %vm302_vm0, %v3375_v54, 0  ;;  %v400_v1 = vand.u32 4294901760, %v352_v28 }
  0x37   : > { %v3410_v43 = vsub.f32 %v3252_v44, %v1090_v59  ;;  %v3413_v57 = vsub.f32 %v3255_v45, %v1093_v15  ;;  %v3953_v58 = vand.u32 4294901760, %v3282_v2  ;;  %v3417_v53 = vsub.f32 %v343_v12, %v391_v27 }
  0x38   : > { %v1105_v38 = vand.u32 4294901760, %v1057_v62  ;;  %v3992_v45 = vand.u32 4294901760, %v3267_v29  ;;  %v3993_v27 = vand.u32 4294901760, %v3277_v7  ;;  %vm1737_vm4 = vcmask 1047557  }
  0x39   : > { %vm1718_vm5 = vcmask 1043456   ;;  %vm1774_vm13 = vcmask 1042432  }
  0x3a   : > { %2603 = vmatpush3.bf16.xpose.msra.mxu0 %v3203_v60  ;;  %v449_v59 = vsub.f32 %v3267_v29, %v3992_v45  ;;  %v3958_v45 = vand.u32 4294901760, %v3299_v6 }
  0x3b   : > { %2747 = vmatpush3.bf16.xpose.msra.mxu1 %v3209_v61  ;;  %2604 = vmatprep.subr.bf16.mxu0 %v3939_v4 }
  0x3c   : > { %2748 = vmatprep.subr.bf16.mxu1 %v3939_v4 }
  0x42   : > { %2606 = vmatpush3.bf16.xpose.msra.mxu0 %v3241_v30  ;;  %v3422_v30 = vsub.f32 %v346_v13, %v394_v34  ;;  %v456_v13 = vsub.f32 %v3277_v7, %v3993_v27  ;;  %v1154_v34 = vsub.f32 %v3282_v2, %v3953_v58  ;;  %v3994_v58 = vand.u32 4294901760, %v3313_v16 }
  0x43   : > { %2750 = vmatpush3.bf16.xpose.msra.mxu1 %v3247_v31  ;;  %2607 = vmatprep.subr.bf16.mxu0 %v3939_v4  ;;  %v3419_v31 = vsub.f32 %v304_v35, %v304_v35  ;;  %v450_v35 = vand.u32 4294901760, %v449_v59 }
  0x44   : > { %2751 = vmatprep.subr.bf16.mxu1 %v3939_v4  ;;  %v1008_v4 = vld [vmem:[%s3061_s30 + $0x68] sm:$0xff]  ;;  %v457_v27 = vand.u32 4294901760, %v456_v13 }
  0x45   : > { %v1051_v24 = vsel %vm302_vm0, %v1008_v4, 0  ;;  %v3346_v4 = vsub.f32 %v3176_v48, %v373_v52  ;;  %v1096_v48 = vand.u32 4294901760, %v1048_v21  ;;  %v1009_v52 = vld [vmem:[%s3061_s30 + $0x70] sm:$0xff] }
  0x46   : > { %v1099_v49 = vand.u32 4294901760, %v1051_v24  ;;  %v1054_v0 = vsel %vm302_vm0, %v1009_v52, 0  ;;  %v3952_v52 = vand.u32 4294901760, %v3287_v5 }
  0x47   : > { %v1102_v56 = vand.u32 4294901760, %v1054_v0  ;;  %v3424_v42 = vsub.f32 %v1048_v21, %v1096_v48  ;;  %v3441_v21 = vsub.f32 %v352_v28, %v400_v1  ;;  %v470_v28 = vsub.f32 %v3299_v6, %v3958_v45 }
  0x48   : > { %v3426_v44 = vsub.f32 %v1051_v24, %v1099_v49  ;;  %v3965_v45 = vand.u32 4294901760, %v3339_v26 }
  0x49   : > { %v3443_v24 = vsub.f32 %v1054_v0, %v1102_v56  ;;  %v3460_v0 = vsub.f32 %v1057_v62, %v1105_v38 }
  0x4a   : > { %2609 = vmatpush3.bf16.xpose.msra.mxu0 %v3301_v8  ;;  %v397_v8 = vand.u32 4294901760, %v349_v19 }
  0x4b   : > { %2753 = vmatpush3.bf16.xpose.msra.mxu1 %v3320_v18  ;;  %2610 = vmatprep.subr.bf16.mxu0 %v3986_v41  ;;  %v3406_v18 = vpack.c.bf16 %v1099_v49, %v1096_v48  ;;  %v1161_v48 = vsub.f32 %v3287_v5, %v3952_v52  ;;  %v3454_v49 = vand.u32 4294901760, %v3419_v31 }
  0x4c   : > { %2754 = vmatprep.subr.bf16.mxu1 %v3986_v41  ;;  %v3433_v15 = vpack.c.bf16 %v400_v1, %v397_v8  ;;  %v3435_v12 = vsub.f32 %v349_v19, %v397_v8  ;;  %v3451_v8 = vpack.c.bf16 %v1105_v38, %v1102_v56  ;;  %v3956_v1 = vand.u32 4294901760, %v3292_v11 }
  0x4d   : > { %3991 = vst [vmem:[#allocation8_spill] sm:$0xff] %v3406_v18  ;;  %v1155_v19 = vand.u32 4294901760, %v1154_v34  ;;  %v438_v59 = vsub.f32 %v3419_v31, %v3454_v49  ;;  %v3957_v34 = vand.u32 4294901760, %v3308_v14  ;;  %v2617_v56 = vpack.c.bf16 %v457_v27, %v450_v35 }
  0x4e   : > { %v463_v62 = vsub.f32 %v3292_v11, %v3956_v1  ;;  %v471_v27 = vand.u32 4294901760, %v470_v28  ;;  %v3959_v1 = vand.u32 4294901760, %v3325_v23 }
  0x4f   : > { %v439_v38 = vand.u32 4294901760, %v438_v59  ;;  %v1168_v13 = vsub.f32 %v3308_v14, %v3957_v34  ;;  %v3961_v59 = vand.u32 4294901760, %v3318_v17  ;;  %v3960_v34 = vand.u32 4294901760, %v3334_v25 }
  0x50   : > { %v464_v35 = vand.u32 4294901760, %v463_v62  ;;  %v484_v28 = vsub.f32 %v3325_v23, %v3959_v1 }
  0x51   : > { %v1182_v62 = vsub.f32 %v3334_v25, %v3960_v34  ;;  %v3969_v34 = vand.u32 4294901760, %v3361_v39 }
  0x52   : > { %2612 = vmatpush3.bf16.xpose.msra.mxu0 %v3399_v51 }
  0x53   : > { %2756 = vmatpush3.bf16.xpose.msra.mxu1 %v3406_v18  ;;  %2613 = vmatprep.subr.bf16.mxu0 %v3986_v41  ;;  %v1162_v18 = vand.u32 4294901760, %v1161_v48  ;;  %v1175_v48 = vsub.f32 %v3313_v16, %v3994_v58  ;;  %v2620_v58 = vpack.c.bf16 %v471_v27, %v464_v35  ;;  %v3962_v35 = vand.u32 4294901760, %v3346_v4 }
  0x54   : > { %2757 = vmatprep.subr.bf16.mxu1 %v3986_v41  ;;  %v3963_v27 = vand.u32 4294901760, %v3351_v36  ;;  %v1183_v1 = vand.u32 4294901760, %v1182_v62  ;;  %v1203_v62 = vsub.f32 %v3361_v39, %v3969_v34 }
  0x55   : > { %v2761_v52 = vpack.c.bf16 %v1162_v18, %v1155_v19  ;;  %v1169_v18 = vand.u32 4294901760, %v1168_v13  ;;  %v1176_v19 = vand.u32 4294901760, %v1175_v48  ;;  %v485_v48 = vand.u32 4294901760, %v484_v28 }
  0x5a   : > { %2615 = vmatpush3.bf16.xpose.msra.mxu0 %v3433_v15 }
  0x5b   : > { %2759 = vmatpush3.bf16.xpose.msra.mxu1 %v3451_v8  ;;  %2616 = vmatprep.subr.bf16.mxu0 %v3986_v41 }
  0x5c   : > { %2760 = vmatprep.subr.bf16.mxu1 %v3986_v41 }
  0x61   : > { %2205 = vmatmul.mubr.f32.vlgmr.msra.gmra.mrb[0].mxu0 %v439_v38 }
  0x62   : > { %2618 = vmatpush3.bf16.xpose.msra.mxu0 %v2617_v56  ;;  %2415 = vmatmul.mubr.f32.vlgmr.msra.gmra.mrb[0].mxu1 %v439_v38  ;;  %v2764_v56 = vpack.c.bf16 %v1176_v19, %v1169_v18  ;;  %v1189_v38 = vsub.f32 %v3339_v26, %v3965_v45  ;;  %v3964_v19 = vand.u32 4294901760, %v3356_v37 }
  0x63   : > { %2762 = vmatpush3.bf16.xpose.msra.mxu1 %v2761_v52  ;;  %2619 = vmatprep.subr.bf16.mxu0 %v3986_v41  ;;  %v477_v52 = vsub.f32 %v3318_v17, %v3961_v59 }
  0x64   : > { %2763 = vmatprep.subr.bf16.mxu1 %v3986_v41  ;;  %2239 = vmatprep.mubr.msk.f32.mxu0 %vm2994_vm1, %v3987_v50  ;;  %v1190_v18 = vand.u32 4294901760, %v1189_v38 }
  0x65   : > { %2449 = vmatprep.mubr.msk.f32.mxu1 %vm2994_vm1, %v3987_v50  ;;  %v478_v13 = vand.u32 4294901760, %v477_v52  ;;  %v498_v52 = vsub.f32 %v3351_v36, %v3963_v27 }
  0x66   : > { %v2767_v28 = vpack.c.bf16 %v1190_v18, %v1183_v1  ;;  %v1204_v1 = vand.u32 4294901760, %v1203_v62  ;;  %v3968_v18 = vand.u32 4294901760, %v3385_v3 }
  0x67   : > { %v2623_v59 = vpack.c.bf16 %v485_v48, %v478_v13  ;;  %v499_v13 = vand.u32 4294901760, %v498_v52  ;;  %v3966_v48 = vand.u32 4294901760, %v3365_v40 }
  0x6a   : > { %2621 = vmatpush3.bf16.xpose.msra.mxu0 %v2620_v58  ;;  %v491_v58 = vsub.f32 %v3346_v4, %v3962_v35  ;;  %v3967_v35 = vand.u32 4294901760, %v3380_v55 }
  0x6b   : > { %2765 = vmatpush3.bf16.xpose.msra.mxu1 %v2764_v56  ;;  %2622 = vmatprep.subr.bf16.mxu0 %v3986_v41  ;;  %v1196_v56 = vsub.f32 %v3356_v37, %v3964_v19  ;;  %v3973_v19 = vand.u32 4294901760, %v3393_v10 }
  0x6c   : > { %2766 = vmatprep.subr.bf16.mxu1 %v3986_v41  ;;  %v492_v38 = vand.u32 4294901760, %v491_v58  ;;  %v512_v58 = vsub.f32 %v3380_v55, %v3967_v35 }
  0x6d   : > { %v1197_v27 = vand.u32 4294901760, %v1196_v56  ;;  %v1217_v56 = vsub.f32 %v3393_v10, %v3973_v19 }
  0x6e   : > { %v2626_v45 = vpack.c.bf16 %v499_v13, %v492_v38  ;;  %v513_v38 = vand.u32 4294901760, %v512_v58  ;;  %v3970_v13 = vand.u32 4294901760, %v3395_v9 }
  0x6f   : > { %v2770_v52 = vpack.c.bf16 %v1204_v1, %v1197_v27  ;;  %v1218_v27 = vand.u32 4294901760, %v1217_v56  ;;  %v3972_v1 = vand.u32 4294901760, %v3410_v43 }
  0x72   : > { %2624 = vmatpush3.bf16.xpose.msra.mxu0 %v2623_v59  ;;  %v505_v59 = vsub.f32 %v3365_v40, %v3966_v48  ;;  %v3971_v48 = vand.u32 4294901760, %v3397_v63 }
  0x73   : > { %2768 = vmatpush3.bf16.xpose.msra.mxu1 %v2767_v28  ;;  %2625 = vmatprep.subr.bf16.mxu0 %v3986_v41  ;;  %v1210_v28 = vsub.f32 %v3385_v3, %v3968_v18  ;;  %v3977_v18 = vand.u32 4294901760, %v3413_v57 }
  0x74   : > { %2769 = vmatprep.subr.bf16.mxu1 %v3986_v41  ;;  %v506_v62 = vand.u32 4294901760, %v505_v59  ;;  %v526_v59 = vsub.f32 %v3397_v63, %v3971_v48 }
  0x75   : > { %v1211_v35 = vand.u32 4294901760, %v1210_v28  ;;  %v1231_v28 = vsub.f32 %v3413_v57, %v3977_v18 }
  0x76   : > { %v2629_v34 = vpack.c.bf16 %v513_v38, %v506_v62  ;;  %v527_v62 = vand.u32 4294901760, %v526_v59  ;;  %v3974_v38 = vand.u32 4294901760, %v3417_v53 }
  0x77   : > { %v2773_v58 = vpack.c.bf16 %v1218_v27, %v1211_v35  ;;  %v1232_v35 = vand.u32 4294901760, %v1231_v28  ;;  %v3976_v27 = vand.u32 4294901760, %v3424_v42 }
  0x7a   : > { %2627 = vmatpush3.bf16.xpose.msra.mxu0 %v2626_v45  ;;  %v519_v45 = vsub.f32 %v3395_v9, %v3970_v13  ;;  %v3975_v13 = vand.u32 4294901760, %v3422_v30 }
  0x7b   : > { %2771 = vmatpush3.bf16.xpose.msra.mxu1 %v2770_v52  ;;  %2628 = vmatprep.subr.bf16.mxu0 %v3986_v41  ;;  %v1224_v52 = vsub.f32 %v3410_v43, %v3972_v1  ;;  %v1244_v1 = vand.u32 4294901760, %v3426_v44 }
  0x7c   : > { %2772 = vmatprep.subr.bf16.mxu1 %v3986_v41  ;;  %v520_v56 = vand.u32 4294901760, %v519_v45  ;;  %v540_v45 = vsub.f32 %v3422_v30, %v3975_v13 }
  0x7d   : > { %v1225_v48 = vand.u32 4294901760, %v1224_v52  ;;  %v1245_v52 = vsub.f32 %v3426_v44, %v1244_v1 }
  0x7e   : > { %v2632_v19 = vpack.c.bf16 %v527_v62, %v520_v56  ;;  %v541_v56 = vand.u32 4294901760, %v540_v45  ;;  %v3978_v62 = vand.u32 4294901760, %v3435_v12 }
  0x7f   : > { %v2776_v59 = vpack.c.bf16 %v1232_v35, %v1225_v48  ;;  %v1246_v48 = vand.u32 4294901760, %v1245_v52  ;;  %v1251_v35 = vand.u32 4294901760, %v3443_v24 }
  0x82   : > { %2630 = vmatpush3.bf16.xpose.msra.mxu0 %v2629_v34  ;;  %v533_v34 = vsub.f32 %v3417_v53, %v3974_v38  ;;  %v3979_v38 = vand.u32 4294901760, %v3441_v21 }
  0x83   : > { %2774 = vmatpush3.bf16.xpose.msra.mxu1 %v2773_v58  ;;  %2631 = vmatprep.subr.bf16.mxu0 %v3986_v41  ;;  %v1238_v58 = vsub.f32 %v3424_v42, %v3976_v27  ;;  %v1258_v27 = vand.u32 4294901760, %v3460_v0 }
  0x84   : > { %2775 = vmatprep.subr.bf16.mxu1 %v3986_v41  ;;  %v534_v28 = vand.u32 4294901760, %v533_v34  ;;  %v554_v34 = vsub.f32 %v3441_v21, %v3979_v38 }
  0x85   : > { %v1239_v13 = vand.u32 4294901760, %v1238_v58  ;;  %v1259_v58 = vsub.f32 %v3460_v0, %v1258_v27 }
  0x86   : > { %v2635_v18 = vpack.c.bf16 %v541_v56, %v534_v28  ;;  %v555_v28 = vand.u32 4294901760, %v554_v34  ;;  %v4000_v34 = vpack.c.bf16 %v3339_v26, %v3334_v25 }
  0x87   : > { %v2779_v45 = vpack.c.bf16 %v1246_v48, %v1239_v13  ;;  %v3996_v48 = vpack.c.bf16 %v3287_v5, %v3282_v2 }
  0x8a   : > { %2633 = vmatpush3.bf16.xpose.msra.mxu0 %v2632_v19  ;;  %v547_v19 = vsub.f32 %v3435_v12, %v3978_v62  ;;  %v1260_v62 = vand.u32 4294901760, %v1259_v58  ;;  %v4003_v58 = vpack.c.bf16 %v3380_v55, %v3365_v40 }
  0x8b   : > { %2777 = vmatpush3.bf16.xpose.msra.mxu1 %v2776_v59  ;;  %2634 = vmatprep.subr.bf16.mxu0 %v3986_v41  ;;  %v1252_v59 = vsub.f32 %v3443_v24, %v1251_v35 }
  0x8c   : > { %2778 = vmatprep.subr.bf16.mxu1 %v3986_v41  ;;  %v548_v52 = vand.u32 4294901760, %v547_v19  ;;  %v3999_v19 = vpack.c.bf16 %v3325_v23, %v3318_v17 }
  0x8d   : > { %v1253_v56 = vand.u32 4294901760, %v1252_v59  ;;  %v4002_v59 = vpack.c.bf16 %v3361_v39, %v3356_v37 }
  0x8e   : > { %v2638_v38 = vpack.c.bf16 %v555_v28, %v548_v52  ;;  %v4004_v52 = vpack.c.bf16 %v3393_v10, %v3385_v3  ;;  %v4005_v28 = vpack.c.bf16 %v3397_v63, %v3395_v9 }
  0x8f   : > { %v2782_v13 = vpack.c.bf16 %v1260_v62, %v1253_v56  ;;  %v3998_v62 = vpack.c.bf16 %v3313_v16, %v3308_v14  ;;  %v4006_v56 = vpack.c.bf16 %v3413_v57, %v3410_v43 }
  0x92   : > { %2636 = vmatpush3.bf16.xpose.msra.mxu0 %v2635_v18  ;;  %v3995_v18 = vpack.c.bf16 %v3277_v7, %v3267_v29 }
  0x93   : > { %2780 = vmatpush3.bf16.xpose.msra.mxu1 %v2779_v45  ;;  %2637 = vmatprep.subr.bf16.mxu0 %v3986_v41  ;;  %v4001_v45 = vpack.c.bf16 %v3351_v36, %v3346_v4 }
  0x94   : > { %2781 = vmatprep.subr.bf16.mxu1 %v3986_v41 }
  0x9a   : > { %2639 = vmatpush3.bf16.xpose.msra.mxu0 %v2638_v38  ;;  %v3997_v38 = vpack.c.bf16 %v3299_v6, %v3292_v11 }
  0x9b   : > { %2783 = vmatpush3.bf16.xpose.msra.mxu1 %v2782_v13  ;;  %2640 = vmatprep.subr.bf16.mxu0 %v3986_v41  ;;  %v4007_v13 = vpack.c.bf16 %v3422_v30, %v3417_v53 }
  0x9c   : > { %2784 = vmatprep.subr.bf16.mxu1 %v3986_v41 }
  0xa1   : > { %2240 = vmatmul.mubr.msk.f32.vlgmr.msra.gmra.mrb[0].mxu0 %vm302_vm0, %v3375_v54 }
  0xa2   : > { %2642 = vmatpush3.bf16.xpose.msra.mxu0 %v3995_v18  ;;  %2450 = vmatmul.mubr.msk.f32.vlgmr.msra.gmra.mrb[0].mxu1 %vm302_vm0, %v3375_v54  ;;  %v4008_v18 = vpack.c.bf16 %v3426_v44, %v3424_v42 }
  0xa3   : > { %2786 = vmatpush3.bf16.xpose.msra.mxu1 %v3996_v48  ;;  %2643 = vmatprep.subr.bf16.mxu0 %v3986_v41  ;;  %v4009_v48 = vpack.c.bf16 %v3441_v21, %v3435_v12 }
  0xa4   : > { %2787 = vmatprep.subr.bf16.mxu1 %v3986_v41  ;;  %2274 = vmatprep.mubr.msk.f32.mxu0 %vm2994_vm1, %v3987_v50 }
  0xa5   : > { %2484 = vmatprep.mubr.msk.f32.mxu1 %vm2994_vm1, %v3987_v50 }
  0xaa   : > { %2645 = vmatpush3.bf16.xpose.msra.mxu0 %v3997_v38  ;;  %v4010_v38 = vpack.c.bf16 %v3460_v0, %v3443_v24 }
  0xab   : > { %2789 = vmatpush3.bf16.xpose.msra.mxu1 %v3998_v62  ;;  %2646 = vmatprep.subr.bf16.mxu0 %v3986_v41  ;;  %v4012_v62 = vld [vmem:[#allocation3_spill] sm:$0xff] }
  0xac   : > { %2790 = vmatprep.subr.bf16.mxu1 %v3986_v41 }
  0xb2   : > { %2648 = vmatpush3.bf16.xpose.msra.mxu0 %v3999_v19  ;;  %v4013_v19 = vld [vmem:[#allocation6_spill] sm:$0xff] }
  0xb3   : > { %2792 = vmatpush3.bf16.xpose.msra.mxu1 %v4000_v34  ;;  %2649 = vmatprep.subr.bf16.mxu0 %v3986_v41  ;;  %v4014_v34 = vld [vmem:[#allocation7_spill] sm:$0xff] }
  0xb4   : > { %2793 = vmatprep.subr.bf16.mxu1 %v3986_v41 }
  0xba   : > { %2651 = vmatpush3.bf16.xpose.msra.mxu0 %v4001_v45  ;;  %v4015_v45 = vld [vmem:[#allocation8_spill] sm:$0xff] }
  0xbb   : > { %2795 = vmatpush3.bf16.xpose.msra.mxu1 %v4002_v59  ;;  %2652 = vmatprep.subr.bf16.mxu0 %v3986_v41  ;;  %v4016_v59 = vand.u32 4294901760, %v3267_v29 }
  0xbc   : > { %2796 = vmatprep.subr.bf16.mxu1 %v3986_v41 }
  0xc2   : > { %2654 = vmatpush3.bf16.xpose.msra.mxu0 %v4003_v58  ;;  %v4017_v58 = vand.u32 4294901760, %v3277_v7  ;;  %v4021_v7 = vand.u32 4294901760, %v3299_v6  ;;  %v4027_v6 = vand.u32 4294901760, %v3339_v26  ;;  %v4033_v26 = vand.u32 4294901760, %v3380_v55 }
  0xc3   : > { %2798 = vmatpush3.bf16.xpose.msra.mxu1 %v4004_v52  ;;  %2655 = vmatprep.subr.bf16.mxu0 %v3986_v41  ;;  %v4039_v55 = vand.u32 4294901760, %v3413_v57  ;;  %v4044_v57 = vand.u32 4294901760, %v3441_v21 }
  0xc4   : > { %2799 = vmatprep.subr.bf16.mxu1 %v3986_v41  ;;  %v2689_v52 = vpack.c.bf16 %v4017_v58, %v4016_v59 }
  0xca   : > { %2657 = vmatpush3.bf16.xpose.msra.mxu0 %v4005_v28  ;;  %v4018_v28 = vand.u32 4294901760, %v3282_v2  ;;  %v4020_v2 = vand.u32 4294901760, %v3292_v11  ;;  %v4026_v11 = vand.u32 4294901760, %v3334_v25  ;;  %v4032_v25 = vand.u32 4294901760, %v3365_v40 }
  0xcb   : > { %2801 = vmatpush3.bf16.xpose.msra.mxu1 %v4006_v56  ;;  %2658 = vmatprep.subr.bf16.mxu0 %v3986_v41  ;;  %v4019_v56 = vand.u32 4294901760, %v3287_v5  ;;  %v4022_v5 = vand.u32 4294901760, %v3308_v14  ;;  %v4028_v14 = vand.u32 4294901760, %v3346_v4  ;;  %v4034_v4 = vand.u32 4294901760, %v3385_v3 }
  0xcc   : > { %2802 = vmatprep.subr.bf16.mxu1 %v3986_v41  ;;  %v2692_v29 = vpack.c.bf16 %v4021_v7, %v4020_v2  ;;  %v2839_v58 = vpack.c.bf16 %v4027_v6, %v4026_v11  ;;  %v4038_v40 = vand.u32 4294901760, %v3410_v43  ;;  %v4041_v3 = vand.u32 4294901760, %v3422_v30 }
  0xcd   : > { %v4043_v43 = vand.u32 4294901760, %v3435_v12  ;;  %v2854_v30 = vpack.c.bf16 %v1258_v27, %v1251_v35 }
  0xce   : > { %v2848_v7 = vpack.c.bf16 %v4039_v55, %v4038_v40 }
  0xd2   : > { %2660 = vmatpush3.bf16.xpose.msra.mxu0 %v4007_v13  ;;  %v2833_v13 = vpack.c.bf16 %v4019_v56, %v4018_v28  ;;  %v2701_v56 = vpack.c.bf16 %v4033_v26, %v4032_v25 }
  0xd3   : > { %2804 = vmatpush3.bf16.xpose.msra.mxu1 %v4008_v18  ;;  %2661 = vmatprep.subr.bf16.mxu0 %v3986_v41 }
  0xd4   : > { %2805 = vmatprep.subr.bf16.mxu1 %v3986_v41 }
  0xda   : > { %2663 = vmatpush3.bf16.xpose.msra.mxu0 %v4009_v48  ;;  %v4024_v48 = vand.u32 4294901760, %v3318_v17  ;;  %v4030_v17 = vand.u32 4294901760, %v3356_v37  ;;  %v4036_v37 = vand.u32 4294901760, %v3395_v9  ;;  %v4042_v9 = vand.u32 4294901760, %v3424_v42 }
  0xdb   : > { %2807 = vmatpush3.bf16.xpose.msra.mxu1 %v4010_v38  ;;  %2664 = vmatprep.subr.bf16.mxu0 %v3986_v41  ;;  %v4025_v38 = vand.u32 4294901760, %v3325_v23  ;;  %v4031_v23 = vand.u32 4294901760, %v3361_v39  ;;  %v4037_v39 = vand.u32 4294901760, %v3397_v63 }
  0xdc   : > { %2808 = vmatprep.subr.bf16.mxu1 %v3986_v41  ;;  %v2851_v63 = vpack.c.bf16 %v1244_v1, %v4042_v9 }
  0xdd   : > { %v2695_v59 = vpack.c.bf16 %v4025_v38, %v4024_v48  ;;  %v2842_v28 = vpack.c.bf16 %v4031_v23, %v4030_v17  ;;  %v2704_v2 = vpack.c.bf16 %v4037_v39, %v4036_v37 }
  0xe1   : > { %2275 = vmatmul.mubr.f32.vlgmr.msra.gmra.mrb[0].mxu0 %v3419_v31 }
  0xe2   : > { %2666 = vmatpush3.bf16.xpose.msra.mxu0 %v3101_v20  ;;  %2485 = vmatmul.mubr.f32.vlgmr.msra.gmra.mrb[0].mxu1 %v3419_v31  ;;  %v4011_v31 = vld [vmem:[#allocation2_spill] sm:$0xff] }
  0xe3   : > { %2810 = vmatpush3.bf16.xpose.msra.mxu1 %v3110_v22  ;;  %2667 = vmatprep.subr.bf16.mxu0 %v3986_v41 }
  0xe4   : > { %2811 = vmatprep.subr.bf16.mxu1 %v3986_v41  ;;  %2309 = vmatprep.mubr.msk.f32.mxu0 %vm2994_vm1, %v3987_v50 }
  0xe5   : > { %2519 = vmatprep.mubr.msk.f32.mxu1 %vm2994_vm1, %v3987_v50 }
  0xea   : > { %2669 = vmatpush3.bf16.xpose.msra.mxu0 %v3131_v32 }
  0xeb   : > { %2813 = vmatpush3.bf16.xpose.msra.mxu1 %v3137_v33  ;;  %2670 = vmatprep.subr.bf16.mxu0 %v3986_v41 }
  0xec   : > { %2814 = vmatprep.subr.bf16.mxu1 %v3986_v41 }
  0xf2   : > { %2672 = vmatpush3.bf16.xpose.msra.mxu0 %v3167_v46 }
  0xf3   : > { %2816 = vmatpush3.bf16.xpose.msra.mxu1 %v3173_v47  ;;  %2673 = vmatprep.subr.bf16.mxu0 %v3986_v41 }
  0xf4   : > { %2817 = vmatprep.subr.bf16.mxu1 %v3986_v41 }
  0xfa   : > { %2675 = vmatpush3.bf16.xpose.msra.mxu0 %v3203_v60 }
  0xfb   : > { %2819 = vmatpush3.bf16.xpose.msra.mxu1 %v3209_v61  ;;  %2676 = vmatprep.subr.bf16.mxu0 %v3986_v41 }
  0xfc   : > { %2820 = vmatprep.subr.bf16.mxu1 %v3986_v41 }
 0x102   : > { %2678 = vmatpush3.bf16.xpose.msra.mxu0 %v4011_v31 }
 0x103   : > { %2822 = vmatpush3.bf16.xpose.msra.mxu1 %v4012_v62  ;;  %2679 = vmatprep.subr.bf16.mxu0 %v3986_v41 }
 0x104   : > { %2823 = vmatprep.subr.bf16.mxu1 %v3986_v41 }
 0x10a   : > { %2681 = vmatpush3.bf16.xpose.msra.mxu0 %v4013_v19 }
 0x10b   : > { %2825 = vmatpush3.bf16.xpose.msra.mxu1 %v4014_v34  ;;  %2682 = vmatprep.subr.bf16.mxu0 %v3986_v41 }
 0x10c   : > { %2826 = vmatprep.subr.bf16.mxu1 %v3986_v41 }
 0x112   : > { %2684 = vmatpush3.bf16.xpose.msra.mxu0 %v3399_v51 }
 0x113   : > { %2828 = vmatpush3.bf16.xpose.msra.mxu1 %v4015_v45  ;;  %2685 = vmatprep.subr.bf16.mxu0 %v3986_v41 }
 0x114   : > { %2829 = vmatprep.subr.bf16.mxu1 %v3986_v41 }
 0x11a   : > { %2687 = vmatpush3.bf16.xpose.msra.mxu0 %v3433_v15 }
 0x11b   : > { %2831 = vmatpush3.bf16.xpose.msra.mxu1 %v3451_v8  ;;  %2688 = vmatprep.subr.bf16.mxu0 %v3986_v41 }
 0x11c   : > { %2832 = vmatprep.subr.bf16.mxu1 %v3986_v41 }
 0x121   : > { %2310 = vmatmul.mubr.f32.vlgmr.msra.gmra.mrb[0].mxu0 %v3454_v49 }
 0x122   : > { %2690 = vmatpush3.bf16.xpose.msra.mxu0 %v2689_v52  ;;  %2520 = vmatmul.mubr.f32.vlgmr.msra.gmra.mrb[0].mxu1 %v3454_v49  ;;  %v4023_v49 = vand.u32 4294901760, %v3313_v16  ;;  %v4029_v16 = vand.u32 4294901760, %v3351_v36  ;;  %v4035_v36 = vand.u32 4294901760, %v3393_v10  ;;  %v4040_v10 = vand.u32 4294901760, %v3417_v53 }
 0x123   : > { %2834 = vmatpush3.bf16.xpose.msra.mxu1 %v2833_v13  ;;  %2691 = vmatprep.subr.bf16.mxu0 %v3986_v41 }
 0x124   : > { %2835 = vmatprep.subr.bf16.mxu1 %v3986_v41  ;;  %2344 = vmatprep.mubr.msk.f32.mxu0 %vm2994_vm1, %v3987_v50  ;;  %v2836_v18 = vpack.c.bf16 %v4023_v49, %v4022_v5  ;;  %v2698_v52 = vpack.c.bf16 %v4029_v16, %v4028_v14  ;;  %v2845_v13 = vpack.c.bf16 %v4035_v36, %v4034_v4  ;;  %v4046_v49 = vld [vmem:[#allocation4_spill] sm:$0xff] }
 0x125   : > { %2554 = vmatprep.mubr.msk.f32.mxu1 %vm2994_vm1, %v3987_v50  ;;  %v2710_v5 = vpack.c.bf16 %v4044_v57, %v4043_v43  ;;  %v3881_v11 = vsub.s32 4, %v4046_v49  ;;  %vm1804_vm9 = vcmp.eq.s32.totalorder %v4046_v49, 0  ;;  %vm1813_vm10 = vcmp.eq.s32.totalorder %v4046_v49, 1 }
 0x126   : > { %vm1822_vm11 = vcmp.eq.s32.totalorder %v4046_v49, 2  ;;  %vm1831_vm14 = vcmp.eq.s32.totalorder %v4046_v49, 3  ;;  %vm1840_vm15 = vcmp.eq.s32.totalorder %v4046_v49, 4 }
 0x12a   : > { %2693 = vmatpush3.bf16.xpose.msra.mxu0 %v2692_v29  ;;  %v2707_v29 = vpack.c.bf16 %v4041_v3, %v4040_v10 }
 0x12b   : > { %2837 = vmatpush3.bf16.xpose.msra.mxu1 %v2836_v18  ;;  %2694 = vmatprep.subr.bf16.mxu0 %v3986_v41  ;;  %v1745_v18 = vcvt.s32.f32 %v4046_v49 }
 0x12c   : > { %2838 = vmatprep.subr.bf16.mxu1 %v3986_v41 }
 0x12d   : > { %v1748_v17 = vrot.slane %v1745_v18, 3 }
 0x132   : > { %2696 = vmatpush3.bf16.xpose.msra.mxu0 %v2695_v59 }
 0x133   : > { %2840 = vmatpush3.bf16.xpose.msra.mxu1 %v2839_v58  ;;  %2697 = vmatprep.subr.bf16.mxu0 %v3986_v41 }
 0x134   : > { %2841 = vmatprep.subr.bf16.mxu1 %v3986_v41 }
 0x13a   : > { %2699 = vmatpush3.bf16.xpose.msra.mxu0 %v2698_v52 }
 0x13b   : > { %2843 = vmatpush3.bf16.xpose.msra.mxu1 %v2842_v28  ;;  %2700 = vmatprep.subr.bf16.mxu0 %v3986_v41 }
 0x13c   : > { %2844 = vmatprep.subr.bf16.mxu1 %v3986_v41 }
 0x142   : > { %2702 = vmatpush3.bf16.xpose.msra.mxu0 %v2701_v56 }
 0x143   : > { %2846 = vmatpush3.bf16.xpose.msra.mxu1 %v2845_v13  ;;  %2703 = vmatprep.subr.bf16.mxu0 %v3986_v41 }
 0x144   : > { %2847 = vmatprep.subr.bf16.mxu1 %v3986_v41 }
 0x14a   : > { %2705 = vmatpush3.bf16.xpose.msra.mxu0 %v2704_v2 }
 0x14b   : > { %2849 = vmatpush3.bf16.xpose.msra.mxu1 %v2848_v7  ;;  %2706 = vmatprep.subr.bf16.mxu0 %v3986_v41 }
 0x14c   : > { %2850 = vmatprep.subr.bf16.mxu1 %v3986_v41 }
 0x152   : > { %2708 = vmatpush3.bf16.xpose.msra.mxu0 %v2707_v29 }
 0x153   : > { %2852 = vmatpush3.bf16.xpose.msra.mxu1 %v2851_v63  ;;  %2709 = vmatprep.subr.bf16.mxu0 %v3986_v41 }
 0x154   : > { %2853 = vmatprep.subr.bf16.mxu1 %v3986_v41 }
 0x15a   : > { %2711 = vmatpush3.bf16.xpose.msra.mxu0 %v2710_v5 }
 0x15b   : > { %2855 = vmatpush3.bf16.xpose.msra.mxu1 %v2854_v30  ;;  %2712 = vmatprep.subr.bf16.mxu0 %v3986_v41 }
 0x15c   : > { %2856 = vmatprep.subr.bf16.mxu1 %v3986_v41 }
 0x161   : > { %2345 = vmatmul.mubr.msk.f32.vlgmr.msra.gmra.mrb[0].mxu0 %vm302_vm0, %v3375_v54 }
 0x162   : > { %2714 = vmatpush3.bf16.xpose.msra.mxu0 %v3101_v20  ;;  %2555 = vmatmul.mubr.msk.f32.vlgmr.msra.gmra.mrb[0].mxu1 %vm302_vm0, %v3375_v54  ;;  %v1703_v20 = vstv %s1962_s3 }
 0x163   : > { %2858 = vmatpush3.bf16.xpose.msra.mxu1 %v3110_v22  ;;  %2715 = vmatprep.subr.bf16.mxu0 %v3986_v41  ;;  %v4045_v22 = vld [vmem:[#allocation5_spill] sm:$0xff] }
 0x164   : > { %2859 = vmatprep.subr.bf16.mxu1 %v3986_v41  ;;  %2379 = vmatprep.mubr.msk.f32.mxu0 %vm2994_vm1, %v3987_v50 }
 0x165   : > { %2589 = vmatprep.mubr.msk.f32.mxu1 %vm2994_vm1, %v3987_v50 }
 0x16a   : > { %2717 = vmatpush3.bf16.xpose.msra.mxu0 %v3131_v32  ;;  %v1704_v32 = vadd.s32 %v1703_v20, %v4045_v22 }
 0x16b   : > { %2861 = vmatpush3.bf16.xpose.msra.mxu1 %v3137_v33  ;;  %2718 = vmatprep.subr.bf16.mxu0 %v3986_v41 }
 0x16c   : > { %2862 = vmatprep.subr.bf16.mxu1 %v3986_v41  ;;  %vm1705_vm3 = vcmp.lt.s32.totalorder %v1704_v32, 338 }
 0x172   : > { %2720 = vmatpush3.bf16.xpose.msra.mxu0 %v3167_v46 }
 0x173   : > { %2864 = vmatpush3.bf16.xpose.msra.mxu1 %v3173_v47  ;;  %2721 = vmatprep.subr.bf16.mxu0 %v3986_v41 }
 0x174   : > { %2865 = vmatprep.subr.bf16.mxu1 %v3986_v41 }
 0x17a   : > { %2723 = vmatpush3.bf16.xpose.msra.mxu0 %v3203_v60 }
 0x17b   : > { %2867 = vmatpush3.bf16.xpose.msra.mxu1 %v3209_v61  ;;  %2724 = vmatprep.subr.bf16.mxu0 %v3986_v41 }
 0x17c   : > { %2868 = vmatprep.subr.bf16.mxu1 %v3986_v41 }
 0x182   : > { %2726 = vmatpush3.bf16.xpose.msra.mxu0 %v4011_v31 }
 0x183   : > { %2870 = vmatpush3.bf16.xpose.msra.mxu1 %v4012_v62  ;;  %2727 = vmatprep.subr.bf16.mxu0 %v3986_v41 }
 0x184   : > { %2871 = vmatprep.subr.bf16.mxu1 %v3986_v41 }
 0x18a   : > { %2729 = vmatpush3.bf16.xpose.msra.mxu0 %v4013_v19 }
 0x18b   : > { %2873 = vmatpush3.bf16.xpose.msra.mxu1 %v4014_v34  ;;  %2730 = vmatprep.subr.bf16.mxu0 %v3986_v41 }
 0x18c   : > { %2874 = vmatprep.subr.bf16.mxu1 %v3986_v41 }
 0x192   : > { %2732 = vmatpush3.bf16.xpose.msra.mxu0 %v3399_v51 }
 0x193   : > { %2876 = vmatpush3.bf16.xpose.msra.mxu1 %v4015_v45  ;;  %2733 = vmatprep.subr.bf16.mxu0 %v3986_v41 }
 0x194   : > { %2877 = vmatprep.subr.bf16.mxu1 %v3986_v41 }
 0x19a   : > { %2735 = vmatpush3.bf16.xpose.msra.mxu0 %v3433_v15 }
 0x19b   : > { %2879 = vmatpush3.bf16.xpose.msra.mxu1 %v3451_v8 }
 0x1a1   : > { %2380 = vmatmul.mubr.msk.f32.vlgmr.msra.gmra.mrb[0].mxu0 %vm302_vm0, %v3375_v54 }
 0x1a2   : > { %2590 = vmatmul.mubr.msk.f32.vlgmr.msra.gmra.mrb[0].mxu1 %vm302_vm0, %v3375_v54  ;;  %vm1849_vm0 = vcmp.eq.s32.totalorder %v4046_v49, 5 }
 0x274   : > { %v991_v33 = vpop.f32.mrb[0].mxu0 }
 0x275   : > { %v3868_v46 = vsel %vm1705_vm3, %v991_v33, 0.0  ;;  %v1696_v47 = vpop.f32.mrb[0].mxu1  ;;  %v2381_v60 = vpop.f32.mrb[1].mxu0 }
 0x276   : > { %v1726_v61 = vmax.f32 %v3868_v46, 0.0  ;;  %v1729_v41 = vand.u32 2147483647, %v3868_v46  ;;  %v1709_v51 = vsel %vm1705_vm3, %v1696_v47, -1.0  ;;  %v1761_v42 = vsel %vm1737_vm4, %v3868_v46, -inf  ;;  %v2591_v54 = vpop.f32.mrb[1].mxu1 }
 0x277   : > { %v1716_v53 = vsub.f32 %v3868_v46, %v1709_v51  ;;  %v1727_v44 = vmul.f32 %v1709_v51, %v3868_v46  ;;  %v1738_v12 = vsel %vm1737_vm4, %v1709_v51, -inf  ;;  %v1762_v0 = vrot.slane %v1761_v42, 4 }
 0x278   : > { %v1730_v15 = vsub.f32 0.0, %v1729_v41  ;;  %v1739_v8 = vrot.slane %v1738_v12, 4  ;;  %vm1710_vm6 = vcmp.eq.f32.partialorder %v1709_v51, 1.0  ;;  %vm1713_vm7 = vcmp.eq.f32.partialorder %v1709_v51, 0.0 }
 0x279   : > { %v1717_v21 = vmul.f32 %v1716_v53, %v1716_v53  ;;  %v3877_v24 = vsub.f32 %v1726_v61, %v1727_v44  ;;  %v1763_v31 = vmax.f32 %v1761_v42, %v1762_v0  ;;  %v3884_v6 = vsel %vm1710_vm6, 1.0, %v3987_v50 }
 0x27a   : > { %v1731_v1 = vmul.f32 1.442695, %v1730_v15  ;;  %v1740_v35 = vmax.f32 %v1738_v12, %v1739_v8  ;;  %v1964_v58 = vsel %vm1713_vm7, 1.0, %v3987_v50  ;;  %v1810_v26 = vrot.slane %v3884_v6, %v3881_v11 }
 0x27b   : > { %v1719_v27 = vsel %vm1718_vm5, %v1717_v21, 0.0  ;;  %v1764_v34 = vrot.slane %v1763_v31, 2  ;;  %v1819_v56 = vrot.slane %v1964_v58, %v3881_v11 }
 0x27c   : > { %2944 = vpow2.f32 %v1731_v1  ;;  %v1720_v62 = vrot.slane %v1719_v27, 4  ;;  %v1741_v19 = vrot.slane %v1740_v35, 2  ;;  %v1811_v10 = vsel %vm1804_vm9, %v1810_v26, 0.0  ;;  %v1858_v26 = vld [vmem:[%s3051_s23] sm:$0x3f] }
 0x27d   : > { %v1765_v38 = vmax.f32 %v1763_v31, %v1764_v34  ;;  %v1820_v3 = vsel %vm1813_vm10, %v1819_v56, 0.0 }
 0x27e   : > { %v1721_v45 = vadd.f32 %v1720_v62, %v1719_v27  ;;  %v1742_v48 = vmax.f32 %v1740_v35, %v1741_v19  ;;  %v1821_v63 = vadd.f32 %v1820_v3, %v1811_v10 }
 0x27f   : > { %v1766_v16 = vrot.slane %v1765_v38, 1 }
 0x280   : > { %v1722_v59 = vrot.slane %v1721_v45, 2  ;;  %v1743_v14 = vrot.slane %v1742_v48, 1 }
 0x281   : > { %v3887_v28 = vmax.f32 %v1765_v38, %v1766_v16 }
 0x282   : > { %v1723_v52 = vadd.f32 %v1722_v59, %v1721_v45  ;;  %v1744_v23 = vmax.f32 %v1742_v48, %v1743_v14 }
 0x283   : > { %v1768_v4 = vsub.f32 %v3868_v46, %v3887_v28 }
 0x284   : > { %v1724_v25 = vrot.slane %v1723_v52, 1  ;;  %vm1746_vm8 = vcmp.eq.f32.partialorder %v1709_v51, %v1744_v23 }
 0x285   : > { %v1750_v37 = vsel %vm1746_vm8, %v1748_v17, 3.0  ;;  %v1769_v40 = vmul.f32 1.442695, %v1768_v4 }
 0x286   : > { %v2945_v36 = vpop.eup %2944  ;;  %v1725_v13 = vadd.f32 %v1724_v25, %v1723_v52  ;;  %v1751_v2 = vsel %vm1737_vm4, %v1750_v37, inf }
 0x287   : > { %v1733_v39 = vadd.f32 1.0, %v2945_v36  ;;  %v1752_v55 = vrot.slane %v1751_v2, 4 }
 0x288   : > { %v1800_v7 = vmul.f32 %v3884_v6, %v1725_v13 }
 0x289   : > { %2946 = vlog2.f32 %v1733_v39  ;;  %v1753_v29 = vmin.f32 %v1751_v2, %v1752_v55 }
 0x28a   : > { %2948 = vpow2.f32 %v1769_v40  ;;  %v1828_v9 = vrot.slane %v1800_v7, %v3881_v11 }
 0x28b   : > { %v1754_v43 = vrot.slane %v1753_v29, 2 }
 0x28c   : > { %v1829_v57 = vsel %vm1822_vm11, %v1828_v9, 0.0 }
 0x28d   : > { %v1830_v5 = vadd.f32 %v1829_v57, %v1821_v63  ;;  %v1755_v30 = vmin.f32 %v1753_v29, %v1754_v43 }
 0x28f   : > { %v1756_v20 = vrot.slane %v1755_v30, 1 }
 0x291   : > { %v1757_v22 = vmin.f32 %v1755_v30, %v1756_v20 }
 0x293   : > { %v2947_v32 = vpop.eup %2946  ;;  %vm1758_vm12 = vcmp.eq.f32.partialorder %v1745_v18, %v1757_v22 }
 0x294   : > { %v2949_v33 = vpop.eup %2948  ;;  %v1735_v47 = vmul.f32 0.6931472, %v2947_v32  ;;  %v1965_v60 = vsel %vm1758_vm12, 1.0, %v3987_v50 }
 0x295   : > { %v1772_v61 = vrot.slane %v2949_v33, 5  ;;  %v1786_v51 = vrot.slane %v1965_v60, 3 }
 0x296   : > { %v1736_v41 = vadd.f32 %v1735_v47, %v3877_v24 }
 0x297   : > { %v1775_v42 = vsel %vm1774_vm13, %v1772_v61, 0.0  ;;  %v1788_v53 = vmul.f32 %v1786_v51, %v3868_v46 }
 0x298   : > { %v1776_v54 = vrot.slane %v1775_v42, 4  ;;  %v1801_v44 = vmul.f32 %v3884_v6, %v1736_v41  ;;  %v1802_v15 = vmul.f32 %v1964_v58, %v1736_v41 }
 0x299   : > { %v1790_v21 = vrot.slane %v1788_v53, 5 }
 0x29a   : > { %v1777_v12 = vadd.f32 %v1776_v54, %v1775_v42  ;;  %v1837_v8 = vrot.slane %v1801_v44, %v3881_v11  ;;  %v1846_v50 = vrot.slane %v1802_v15, %v3881_v11 }
 0x29b   : > { %v1792_v0 = vsel %vm1774_vm13, %v1790_v21, 0.0 }
 0x29c   : > { %v1778_v24 = vrot.slane %v1777_v12, 2  ;;  %v1838_v1 = vsel %vm1831_vm14, %v1837_v8, 0.0  ;;  %v1793_v27 = vrot.slane %v1792_v0, 4  ;;  %v1847_v31 = vsel %vm1840_vm15, %v1846_v50, 0.0 }
 0x29d   : > { %v1839_v35 = vadd.f32 %v1838_v1, %v1830_v5 }
 0x29e   : > { %v1779_v46 = vadd.f32 %v1778_v24, %v1777_v12  ;;  %v1794_v34 = vadd.f32 %v1793_v27, %v1792_v0 }
 0x29f   : > { %v1848_v62 = vadd.f32 %v1847_v31, %v1839_v35 }
 0x2a0   : > { %v1780_v19 = vrot.slane %v1779_v46, 1  ;;  %v1795_v18 = vrot.slane %v1794_v34, 2 }
 0x2a2   : > { %v1781_v45 = vadd.f32 %v1780_v19, %v1779_v46  ;;  %v1796_v48 = vadd.f32 %v1795_v18, %v1794_v34 }
 0x2a4   : > { %2950 = vlog2.f32 %v1781_v45  ;;  %v1797_v38 = vrot.slane %v1796_v48, 1 }
 0x2a6   : > { %v1798_v16 = vadd.f32 %v1797_v38, %v1796_v48 }
 0x2ae   : > { %v2951_v59 = vpop.eup %2950 }
 0x2af   : > { %v1783_v58 = vmul.f32 0.6931472, %v2951_v59 }
 0x2b1   : > { %v1784_v14 = vadd.f32 %v1783_v58, %v3887_v28 }
 0x2b3   : > { %v1799_v52 = vsub.f32 %v1784_v14, %v1798_v16 }
 0x2b5   : > { %v1803_v17 = vmul.f32 %v3884_v6, %v1799_v52 }
 0x2b7   : > { %v1855_v23 = vrot.slane %v1803_v17, %v3881_v11 }
 0x2b9   : > { %v1856_v25 = vsel %vm1849_vm0, %v1855_v23, 0.0 }
 0x2ba   : > { %v1857_v56 = vadd.f32 %v1856_v25, %v1848_v62 }
 0x2bc   : > { %v1859_v4 = vadd.f32 %v1858_v26, %v1857_v56 }
 0x2be   : > { %1860 = vst [vmem:[%s3051_s23] sm:$0x3f] %v1859_v4 }
 0x2bf PF: > { %s12_s13 = sadd.s32 1, %s2990_s13   ;;  %s4047_s9 = smov %s2982_s11 }
 0x2c0   : > { %p9_p9 = scmp.ge.s32.totalorder %s12_s13, 6   ;;  %s4048_s10 = smov %s2986_s12 }
 0x2c1   : > { %s4049_s11 = smov %s4052_s14  ;;  %s4050_s12 = smov %s4056_s15 }
 0x2c2   :  { %11 = sbr.rel (!%p9_p9) target bundleno = 3 (0x3), region = 65 }

</bundles_post_ra>
